<compile_context>
chip_gen: v7x
topology: tpu7x:2x2x1
jax: 0.10.0
libtpu: 0.0.40
codegen_flags: <defaults>
</compile_context>

<pallas_src>
import functools
import math

import jax
import jax.numpy as jnp
from jax.experimental import pallas as pl
from jax.experimental.pallas import tpu as pltpu


def _round_up(x, m):
    return (x + m - 1) // m * m


def make_positional_encoding(d_model, max_len=5000):
    """Sinusoidal PE buffer, shape (max_len, d_model), float32.

    Matches torch: pe[:, 0::2] = sin(pos * div_term), pe[:, 1::2] = cos(pos * div_term).
    Also handles odd d_model by truncating the interleaved table.
    """
    position = jnp.arange(max_len, dtype=jnp.float32)[:, None]        # (max_len, 1)
    half = (d_model + 1) // 2
    div_term = jnp.exp(
        jnp.arange(0, 2 * half, 2, dtype=jnp.float32) * (-math.log(10000.0) / d_model)
    )                                                                  # (half,)
    ang = position * div_term                                          # (max_len, half)
    pe = jnp.stack([jnp.sin(ang), jnp.cos(ang)], axis=-1).reshape(max_len, 2 * half)
    return pe[:, :d_model]                                             # (max_len, d_model)


# ----------------------------- kernels --------------------------------------

def _add_pe_flat_kernel(x_ref, pe_ref, o_ref, *, batch, d_model):
    # x_ref / o_ref: (tS, B*D), pe_ref: (tS, D). D is a multiple of 128, so every
    # slice below is a lane-aligned dense load/store; pe is loaded once per tile
    # and reused for all batch slices.
    pe = pe_ref[...].astype(jnp.float32)
    for b in range(batch):
        sl = slice(b * d_model, (b + 1) * d_model)
        o_ref[:, sl] = (x_ref[:, sl].astype(jnp.float32) + pe).astype(o_ref.dtype)


def _add_pe_3d_kernel(x_ref, pe_ref, o_ref):
    # x_ref / o_ref: (tS, B, D), pe_ref: (tS, 1, D); broadcast along batch on the VPU.
    x = x_ref[...].astype(jnp.float32)
    pe = pe_ref[...].astype(jnp.float32)
    o_ref[...] = (x + pe).astype(o_ref.dtype)


# ----------------------------- wrapper ---------------------------------------

def _pick_row_tile(n_rows, bytes_per_row, target_bytes=2 * 1024 * 1024):
    """Largest multiple-of-8 S-tile whose x block stays under target_bytes."""
    if n_rows * bytes_per_row <= target_bytes:
        return int(n_rows)
    ts = (target_bytes // bytes_per_row) // 8 * 8
    return int(max(8, min(ts, n_rows)))


def positional_encoding_forward(x, pe):
    """x: (S, B, D); pe: (max_len, D) float32. Returns x + pe[:S, None, :]."""
    S, B, D = x.shape
    max_len, d_pe = pe.shape
    if d_pe != D:
        raise ValueError(f"pe d_model {d_pe} != x d_model {D}")
    if S > max_len:
        raise ValueError(f"sequence length {S} exceeds max_len {max_len}")

    itemsize = jnp.dtype(x.dtype).itemsize
    compiler_params = pltpu.CompilerParams(dimension_semantics=("parallel",))

    if D % 128 == 0:
        # Lane-dense path: view x as (S, B*D); batch never touches the sublane axis.
        x2 = x.reshape(S, B * D)                     # free: contiguous reshape
        row_bytes = B * D * itemsize
        ts = _pick_row_tile(S, row_bytes)
        grid = (pl.cdiv(S, ts),)
        out2 = pl.pallas_call(
            functools.partial(_add_pe_flat_kernel, batch=B, d_model=D),
            out_shape=jax.ShapeDtypeStruct((S, B * D), x.dtype),
            grid=grid,
            in_specs=[
                pl.BlockSpec((ts, B * D), lambda i: (i, 0)),
                pl.BlockSpec((ts, D), lambda i: (i, 0)),
            ],
            out_specs=pl.BlockSpec((ts, B * D), lambda i: (i, 0)),
            compiler_params=compiler_params,
        )(x2, pe)
        return out2.reshape(S, B, D)

    # Fallback for small / non-lane-aligned d_model (e.g. the demo): 3-D blocks.
    pe3 = pe.reshape(max_len, 1, D)                  # free reshape, no transpose
    # Size tiles by the padded VMEM footprint (sublane pads to 8, lanes to 128).
    row_bytes = _round_up(B, 8) * _round_up(D, 128) * itemsize
    ts = _pick_row_tile(S, row_bytes)
    grid = (pl.cdiv(S, ts),)
    return pl.pallas_call(
        _add_pe_3d_kernel,
        out_shape=jax.ShapeDtypeStruct((S, B, D), x.dtype),
        grid=grid,
        in_specs=[
            pl.BlockSpec((ts, B, D), lambda i: (i, 0, 0)),
            pl.BlockSpec((ts, 1, D), lambda i: (i, 0, 0)),
        ],
        out_specs=pl.BlockSpec((ts, B, D), lambda i: (i, 0, 0)),
        compiler_params=compiler_params,
    )(x, pe3)


if __name__ == "__main__":
    key = jax.random.PRNGKey(0)

    # Small shapes consistent with the module's forward: seq=8, batch=2, d_model=32.
    S, B, D = 8, 2, 32
    max_len = 64
    x = jax.random.normal(key, (S, B, D), dtype=jnp.float32)
    pe = make_positional_encoding(D, max_len=max_len)

    out = jax.block_until_ready(positional_encoding_forward(x, pe))
    ref = x + pe[:S][:, None, :]
    assert out.shape == (S, B, D)
    assert jnp.allclose(out, ref, atol=1e-6), "mismatch vs reference (3-D fallback path)"

    # Also exercise the lane-dense flattened path with a small aligned d_model.
    S2, B2, D2 = 16, 2, 128
    x2 = jax.random.normal(jax.random.PRNGKey(0), (S2, B2, D2), dtype=jnp.float32)
    pe2 = make_positional_encoding(D2, max_len=max_len)
    out2 = jax.block_until_ready(positional_encoding_forward(x2, pe2))
    ref2 = x2 + pe2[:S2][:, None, :]
    assert jnp.allclose(out2, ref2, atol=1e-6), "mismatch vs reference (lane-dense path)"

    print("KERNEL_OK")
</pallas_src>

<mosaic_0001>
module attributes {stable_mosaic.version = 11 : i64} {
  func.func @_add_pe_3d_kernel(%arg0: i32, %arg1: memref<8x2x32xf32, #tpu.memory_space<vmem>>, %arg2: memref<8x1x32xf32, #tpu.memory_space<vmem>>, %arg3: memref<8x2x32xf32, #tpu.memory_space<vmem>>) attributes {dimension_semantics = [#tpu.dimension_semantics<parallel>], iteration_bounds = array<i64: 1>, scalar_prefetch = 0 : i64, scratch_operands = 0 : i64, tpu.core_type = #tpu.core_type<tc>, window_params = [{transform_indices = @transform_0, window_bounds = array<i64: 8, 2, 32>}, {transform_indices = @transform_1, window_bounds = array<i64: 8, 1, 32>}, {transform_indices = @transform_2, window_bounds = array<i64: 8, 2, 32>}]} {
    %c0 = arith.constant 0 : index
    %c0_0 = arith.constant 0 : index
    %c0_1 = arith.constant 0 : index
    %0 = vector.load %arg1[%c0, %c0_0, %c0_1] : memref<8x2x32xf32, #tpu.memory_space<vmem>>, vector<8x2x32xf32>
    %c0_2 = arith.constant 0 : index
    %c0_3 = arith.constant 0 : index
    %c0_4 = arith.constant 0 : index
    %1 = vector.load %arg2[%c0_2, %c0_3, %c0_4] : memref<8x1x32xf32, #tpu.memory_space<vmem>>, vector<8x1x32xf32>
    %2 = vector.broadcast %1 : vector<8x1x32xf32> to vector<8x2x32xf32>
    %3 = arith.addf %0, %2 : vector<8x2x32xf32>
    %c0_5 = arith.constant 0 : index
    %c0_6 = arith.constant 0 : index
    %c0_7 = arith.constant 0 : index
    %4 = vector.load %arg3[%c0_5, %c0_6, %c0_7] : memref<8x2x32xf32, #tpu.memory_space<vmem>>, vector<8x2x32xf32>
    tpu.vector_store %arg3[%c0_5, %c0_6, %c0_7], %3 {strides = array<i32>} : memref<8x2x32xf32, #tpu.memory_space<vmem>>, vector<8x2x32xf32>,
    return
  }
  func.func @transform_0(%arg0: i32) -> (i32, i32, i32) {
    %c0_i32 = arith.constant 0 : i32
    %c0_i32_0 = arith.constant 0 : i32
    %c0_i32_1 = arith.constant 0 : i32
    return %arg0, %c0_i32, %c0_i32_0 : i32, i32, i32
  }
  func.func @transform_1(%arg0: i32) -> (i32, i32, i32) {
    %c0_i32 = arith.constant 0 : i32
    %c0_i32_0 = arith.constant 0 : i32
    %c0_i32_1 = arith.constant 0 : i32
    return %arg0, %c0_i32, %c0_i32_0 : i32, i32, i32
  }
  func.func @transform_2(%arg0: i32) -> (i32, i32, i32) {
    %c0_i32 = arith.constant 0 : i32
    %c0_i32_0 = arith.constant 0 : i32
    %c0_i32_1 = arith.constant 0 : i32
    return %arg0, %c0_i32, %c0_i32_0 : i32, i32, i32
  }
}

</mosaic_0001>

<bundles_post_ra>
// kernel: tpu_custom_call.1
= control target key start
LH: loop header
LB: loop body
LE: loop exit
PB: predicated region body
PF: predicated region fallthrough
CT: control target
= control target key end

     0   :  { %vm84_vm0 = vcmask 254976   ;;  %s230_s0 = inlined_call_operand.vmem [shape: f32[8,2,32], index: 0, kind: input, shape index: {}]   ;;  %s231_s1 = inlined_call_operand.vmem [shape: f32[64,1,32], index: 1, kind: input, shape index: {}]   ;;  %s232_s2 = inlined_call_operand.hbm [shape: f32[8,2,32], index: 2, kind: output, shape index: {}]  }
   0x1   :  { %v12_v0 = vld [vmem:[%s230_s0] sm:$0x3]  ;;  %v13_v3 = vld [vmem:[%s230_s0 + $0x2] sm:$0x3]  ;;  %v14_v5 = vld [vmem:[%s230_s0 + $0x4] sm:$0x3] }
   0x2   :  { %v109_v1 = vld [vmem:[%s231_s1] ss:$0 sm:$0xff]  ;;  %v110_v4 = vld [vmem:[%s231_s1 + $0x1] ss:$0 sm:$0xff]  ;;  %v111_v7 = vld [vmem:[%s231_s1 + $0x2] ss:$0 sm:$0xff] }
   0x3   :  { %v76_v2 = vadd.f32 %v109_v1, %v12_v0  ;;  %v77_v6 = vadd.f32 %v110_v4, %v13_v3  ;;  %v15_v8 = vld [vmem:[%s230_s0 + $0x6] sm:$0x3]  ;;  %v112_v9 = vld [vmem:[%s231_s1 + $0x3] ss:$0 sm:$0xff]  ;;  %v78_v10 = vadd.f32 %v111_v7, %v14_v5  ;;  %v16_v12 = vld [vmem:[%s230_s0 + $0x8] sm:$0x3] }
   0x4   :  { %v79_v11 = vadd.f32 %v112_v9, %v15_v8  ;;  %v113_v13 = vld [vmem:[%s231_s1 + $0x4] ss:$0 sm:$0xff]  ;;  %v17_v14 = vld [vmem:[%s230_s0 + $0xa] sm:$0x3]  ;;  %v114_v16 = vld [vmem:[%s231_s1 + $0x5] ss:$0 sm:$0xff] }
   0x5   :  { %85 = vst.msk [vmem:[#allocation2] sm:$0x3] %vm84_vm0, %v76_v2  ;;  %86 = vst.msk [vmem:[#allocation2 + $0x2] sm:$0x3] %vm84_vm0, %v77_v6  ;;  %v80_v15 = vadd.f32 %v113_v13, %v16_v12  ;;  %v18_v17 = vld [vmem:[%s230_s0 + $0xc] sm:$0x3]  ;;  %v81_v19 = vadd.f32 %v114_v16, %v17_v14 }
   0x6   :  { %v115_v18 = vld [vmem:[%s231_s1 + $0x6] ss:$0 sm:$0xff]  ;;  %87 = vst.msk [vmem:[#allocation2 + $0x4] sm:$0x3] %vm84_vm0, %v78_v10  ;;  %88 = vst.msk [vmem:[#allocation2 + $0x6] sm:$0x3] %vm84_vm0, %v79_v11 }
   0x7   :  { %v82_v20 = vadd.f32 %v115_v18, %v18_v17  ;;  %v19_v21 = vld [vmem:[%s230_s0 + $0xe] sm:$0x3]  ;;  %v116_v22 = vld [vmem:[%s231_s1 + $0x7] ss:$0 sm:$0xff] }
   0x8   :  { %7 = vsyncpa [#allocation3], 0  ;;  %89 = vst.msk [vmem:[#allocation2 + $0x8] sm:$0x3] %vm84_vm0, %v80_v15  ;;  %v83_v23 = vadd.f32 %v116_v22, %v19_v21  ;;  %s144_s13 = smov [#allocation2]  }
   0x9   :  { %s98_s14 = sshll.u32 %s144_s13, 4  ;;  %90 = vst.msk [vmem:[#allocation2 + $0xa] sm:$0x3] %vm84_vm0, %v81_v19  ;;  %91 = vst.msk [vmem:[#allocation2 + $0xc] sm:$0x3] %vm84_vm0, %v82_v20  ;;  %s99_s14 = int_to_ptr.vmem [resolvable:$true] %s98_s14 }
   0xa   :  { %92 = vst.msk [vmem:[#allocation2 + $0xe] sm:$0x3] %vm84_vm0, %v83_v23  ;;  %s120_s15 = scalar_lea.vmem %s99_s14, 256  ;;  %p125_p1 = scmp.lt.s32.totalorder %s99_s14, %s99_s14 }
   0xb   :  { %p121_p0 = scmp.ne.s32.totalorder %s99_s14, %s120_s15  ;;  %p126_p2 = scmp.lt.s32.totalorder %s120_s15, %s120_s15 }
   0xd   :  { %p127_p3 = por %p126_p2, %p125_p1 }
   0xf   :  { %p128_p4 = pnand %p127_p3, %p121_p0 }
  0x11   :  { %131 = shalt.err (!%p128_p4)
}
  0x12   :  { %s132_s16 = scalar_lea.hbm %s232_s2, 256 }
  0x13   :  { %p133_p5 = scmp.ne.s32.totalorder %s232_s2, %s132_s16  ;;  %p136_p6 = scmp.lt.u32.totalorder %s132_s16, %s232_s2 }
  0x15   :  { %p138_p7 = pnand %p136_p6, %p133_p5 }
  0x17   :  { %141 = shalt.err (!%p138_p7)
}
  0x18   :  { %s145_s21 = smov 32   ;;  %s146_s22 = smov 2  }
  0x19   :  { %104 = dma.vmem_to_hbm [thread:$0]  %s99_s14, 256, %s232_s2, [#allocation3], %s145_s21, %s145_s21, %s146_s22  }
  0x1a   :  { %142 = dma.done.wait [#allocation3], 256  }
  0x1b   :  { %143 = vsyncadd [#allocation3], 4294967040 }
  0x1c   :  { %108 = vsyncpa [#allocation3], 1 }

</bundles_post_ra>
